<compile_context>
chip_gen: v7x
topology: tpu7x:2x2x1
jax: 0.10.0
libtpu: 0.0.40
codegen_flags: <defaults>
</compile_context>

<pallas_src>
import functools
import math

import jax
import jax.numpy as jnp
from jax import lax
from jax.experimental import pallas as pl
from jax.experimental.pallas import tpu as pltpu


# ----------------------------------------------------------------------------
# Tiled linear kernel:  y[p] = x[p] @ wT[p] + b[p]
#   grid = (P, M-tiles, N-tiles, K-tiles), K innermost reduction.
# ----------------------------------------------------------------------------
def _linear_kernel(x_ref, wt_ref, b_ref, o_ref, acc_ref):
    @pl.when(pl.program_id(3) == 0)
    def _init():
        acc_ref[...] = jnp.zeros_like(acc_ref)

    acc_ref[...] += jnp.dot(x_ref[0], wt_ref[0],
                            preferred_element_type=jnp.float32)

    @pl.when(pl.program_id(3) == pl.num_programs(3) - 1)
    def _finalize():
        o_ref[0] = (acc_ref[...] + b_ref[0]).astype(o_ref.dtype)


def _pick_tile(dim, target, align):
    """Largest multiple of `align` that divides `dim` and is <= `target`;
    falls back to the full dimension (always a legal Mosaic block)."""
    t = min(target, dim)
    t -= t % align
    while t >= align:
        if dim % t == 0:
            return t
        t -= align
    return dim


def stacked_linear(xs, wts, bs, *, tm=512, tn=512, tk=512):
    """xs: (P, M, K), wts: (P, K, N) (already transposed), bs: (P, 1, N)."""
    P, M, K = xs.shape
    N = wts.shape[-1]
    tm = _pick_tile(M, tm, 8)      # sublane-aligned M tile
    tn = _pick_tile(N, tn, 128)    # lane-aligned N tile (lane-dense stores)
    tk = _pick_tile(K, tk, 128)    # lane/sublane-aligned K tile
    grid = (P, M // tm, N // tn, K // tk)
    return pl.pallas_call(
        _linear_kernel,
        out_shape=jax.ShapeDtypeStruct((P, M, N), xs.dtype),
        grid=grid,
        in_specs=[
            pl.BlockSpec((1, tm, tk), lambda p, i, j, k: (p, i, k)),
            pl.BlockSpec((1, tk, tn), lambda p, i, j, k: (p, k, j)),
            pl.BlockSpec((1, 1, tn), lambda p, i, j, k: (p, 0, j)),
        ],
        out_specs=pl.BlockSpec((1, tm, tn), lambda p, i, j, k: (p, i, j)),
        scratch_shapes=[pltpu.VMEM((tm, tn), jnp.float32)],
        compiler_params=pltpu.CompilerParams(
            dimension_semantics=("parallel", "parallel", "parallel",
                                 "arbitrary")),
    )(xs, wts, bs)


# ----------------------------------------------------------------------------
# Scaled dot-product attention, tiled over query rows.
#   grid = (B, S // tq); k/v for the current batch element stay resident
#   across the q-tile axis (same block index), so they are DMA'd once per b.
# ----------------------------------------------------------------------------
def _attn_kernel(q_ref, k_ref, v_ref, ctx_ref, attn_ref, ctx_acc,
                 *, nheads, dk):
    scale = 1.0 / math.sqrt(dk)
    # Fold 1/sqrt(dk) into q (tq*D mults instead of tq*S per head); keep the
    # activation dtype so bf16 inputs keep a bf16 MXU path.
    q = q_ref[0] * jnp.asarray(scale, dtype=q_ref.dtype)   # (tq, D)
    k = k_ref[0]                                           # (S, D)
    v = v_ref[0]                                           # (S, D)

    for h in range(nheads):                                # static unroll
        lo, hi = h * dk, (h + 1) * dk
        # scores = q_h @ k_h^T, f32 accumulation on the MXU.
        scores = lax.dot_general(
            q[:, lo:hi], k[:, lo:hi],
            dimension_numbers=(((1,), (1,)), ((), ())),
            preferred_element_type=jnp.float32)            # (tq, S) f32

        # Numerically stable softmax, all math in f32 (v5e-friendly).
        m = jnp.max(scores, axis=-1, keepdims=True)
        e = jnp.exp(scores - m)
        # EUP reciprocal co-issues with the VALU epilogue work.
        inv_l = pl.reciprocal(jnp.sum(e, axis=-1, keepdims=True), approx=True)
        p = e * inv_l

        attn_ref[0, h] = p.astype(attn_ref.dtype)
        # P @ V in the activation dtype, f32 accumulation, written straight
        # into this head's column slice of the VMEM scratch (no concat, only
        # one head's temporaries live at a time).
        ctx_acc[:, lo:hi] = jnp.dot(p.astype(v.dtype), v[:, lo:hi],
                                    preferred_element_type=jnp.float32)

    # Single lane-dense (tq, D) store; column order already matches torch's
    # transpose(1,2).contiguous().view(B, S, H*dk), so no XLA transpose after.
    ctx_ref[0] = ctx_acc[...].astype(ctx_ref.dtype)


def _vmem_capacity_bytes():
    try:
        return int(pltpu.get_tpu_info().vmem_capacity_bytes)
    except Exception:
        return 64 * 1024 * 1024   # conservative: v7x per-TC VMEM


def _pick_attn_tile(S, D, nheads, act_bytes, attn_bytes, budget):
    """Largest q-tile (multiple of 8 dividing S, capped at 256) whose
    double-buffered working set fits the VMEM budget."""
    def est(tq):
        q_ctx = 4 * tq * D * act_bytes              # q + ctx, double-buffered
        kv = 4 * S * D * act_bytes                  # k + v, double-buffered
        attn = 2 * nheads * tq * S * attn_bytes     # attention-prob block
        scratch = tq * D * 4
        temps = 4 * tq * S * 4                      # scores/e/p f32 temporaries
        return q_ctx + kv + attn + scratch + temps

    t = min(256, S)
    t -= t % 8
    while t >= 8:
        if S % t == 0 and est(t) <= budget:
            return t
        t -= 8
    return S   # tiny / awkward S: full extent is always a legal block


def scaled_dot_product_attention(q3, k3, v3, nheads):
    # q3/k3/v3: (B, S, D) with head h occupying columns [h*dk, (h+1)*dk).
    B, S, D = q3.shape
    dk = D // nheads
    act_bytes = jnp.dtype(q3.dtype).itemsize
    attn_dtype = q3.dtype            # match the reference's output dtype
    attn_bytes = jnp.dtype(attn_dtype).itemsize

    # ~75% of physical VMEM: ~48 MiB on v7x, ~96 MiB on v5e/v6e.
    budget = int(0.75 * _vmem_capacity_bytes())
    tq = _pick_attn_tile(S, D, nheads, act_bytes, attn_bytes, budget)

    q_spec = pl.BlockSpec((1, tq, D), lambda b, i: (b, i, 0))
    kv_spec = pl.BlockSpec((1, S, D), lambda b, i: (b, 0, 0))
    ctx_spec = pl.BlockSpec((1, tq, D), lambda b, i: (b, i, 0))
    attn_spec = pl.BlockSpec((1, nheads, tq, S), lambda b, i: (b, 0, i, 0))

    ctx, attn = pl.pallas_call(
        functools.partial(_attn_kernel, nheads=nheads, dk=dk),
        out_shape=(
            jax.ShapeDtypeStruct((B, S, D), q3.dtype),
            jax.ShapeDtypeStruct((B, nheads, S, S), attn_dtype),
        ),
        grid=(B, S // tq),
        in_specs=[q_spec, kv_spec, kv_spec],
        out_specs=(ctx_spec, attn_spec),
        scratch_shapes=[pltpu.VMEM((tq, D), jnp.float32)],
        compiler_params=pltpu.CompilerParams(
            dimension_semantics=("parallel", "parallel"),
            vmem_limit_bytes=budget),
    )(q3, k3, v3)
    return ctx, attn


# ----------------------------------------------------------------------------
# MultiHeadedAttention forward
# ----------------------------------------------------------------------------
def prepare_params(params):
    """One-time (outside jit) weight preprocessing: pre-transpose + pre-stack
    so the per-call forward pays zero weight-layout HBM traffic."""
    return {
        "wqkv_t": jnp.stack([params["wq"].T, params["wk"].T, params["wv"].T]),
        "bqkv": jnp.stack([params["bq"], params["bk"],
                           params["bv"]])[:, None, :],
        "wo_t": params["wo"].T[None, :, :],
        "bo": params["bo"][None, None, :],
    }


@functools.partial(jax.jit, static_argnames=("nheads",))
def multi_headed_attention(querys, keys, values, prepped, *, nheads):
    B, S, D = querys.shape
    M = B * S

    # Fused Q/K/V projection: a single pallas_call over a stacked (3, M, D)
    # batch with weights already transposed/stacked by prepare_params.
    xs = jnp.stack([querys.reshape(M, D), keys.reshape(M, D),
                    values.reshape(M, D)])
    qkv = stacked_linear(xs, prepped["wqkv_t"], prepped["bqkv"])   # (3, M, D)
    q3 = qkv[0].reshape(B, S, D)
    k3 = qkv[1].reshape(B, S, D)
    v3 = qkv[2].reshape(B, S, D)

    ctx, attn = scaled_dot_product_attention(q3, k3, v3, nheads)

    # Output projection directly on the (B*S, D) context (already in the
    # reference's concat-heads layout) — no HBM transposes in between.
    out = stacked_linear(ctx.reshape(1, M, D),
                         prepped["wo_t"], prepped["bo"])[0]
    return out.reshape(B, S, D), attn


def init_params(key, d_model):
    # Deterministic init matching nn.Linear shapes: W (out, in), b (out,).
    ks = jax.random.split(key, 8)
    bound = 1.0 / math.sqrt(d_model)

    def w(k):
        return jax.random.uniform(k, (d_model, d_model), jnp.float32,
                                  -bound, bound)

    def b(k):
        return jax.random.uniform(k, (d_model,), jnp.float32, -bound, bound)

    return {
        "wq": w(ks[0]), "bq": b(ks[1]),
        "wk": w(ks[2]), "bk": b(ks[3]),
        "wv": w(ks[4]), "bv": b(ks[5]),
        "wo": w(ks[6]), "bo": b(ks[7]),
    }


if __name__ == "__main__":
    B, S, D, H = 2, 8, 32, 4

    key = jax.random.PRNGKey(0)
    kq, kk, kv, kp = jax.random.split(key, 4)
    querys = jax.random.normal(kq, (B, S, D), jnp.float32)
    keys = jax.random.normal(kk, (B, S, D), jnp.float32)
    values = jax.random.normal(kv, (B, S, D), jnp.float32)
    params = init_params(kp, D)
    prepped = prepare_params(params)          # one-time, outside the jit

    out, attn = multi_headed_attention(querys, keys, values, prepped,
                                       nheads=H)
    jax.block_until_ready((out, attn))

    # Reference check in plain JAX (same math, eval-mode dropout).
    def ref(q, k, v, p):
        def lin(x, w, b):
            return x @ w.T + b
        dk = D // H
        pq = lin(q, p["wq"], p["bq"]).reshape(B, S, H, dk).transpose(0, 2, 1, 3)
        pk = lin(k, p["wk"], p["bk"]).reshape(B, S, H, dk).transpose(0, 2, 1, 3)
        pv = lin(v, p["wv"], p["bv"]).reshape(B, S, H, dk).transpose(0, 2, 1, 3)
        sc = jnp.einsum("bhqd,bhkd->bhqk", pq, pk) / math.sqrt(dk)
        pr = jax.nn.softmax(sc, axis=-1)
        ctx = jnp.einsum("bhqk,bhkd->bhqd", pr, pv)
        ctx = ctx.transpose(0, 2, 1, 3).reshape(B, S, D)
        return lin(ctx, p["wo"], p["bo"]), pr

    out_ref, attn_ref = ref(querys, keys, values, params)
    # approx-reciprocal softmax denominators drift at the ~1e-4 relative level.
    assert jnp.allclose(out, out_ref, atol=2e-3, rtol=2e-3)
    assert jnp.allclose(attn, attn_ref, atol=2e-3, rtol=2e-3)

    print("KERNEL_OK")
</pallas_src>

<mosaic_0001>
module attributes {stable_mosaic.version = 11 : i64} {
  func.func @_linear_kernel(%arg0: i32, %arg1: i32, %arg2: i32, %arg3: i32, %arg4: memref<1x16x32xf32, #tpu.memory_space<vmem>>, %arg5: memref<1x32x32xf32, #tpu.memory_space<vmem>>, %arg6: memref<1x1x32xf32, #tpu.memory_space<vmem>>, %arg7: memref<1x16x32xf32, #tpu.memory_space<vmem>>, %arg8: memref<16x32xf32, #tpu.memory_space<vmem>>) attributes {dimension_semantics = [#tpu.dimension_semantics<parallel>, #tpu.dimension_semantics<parallel>, #tpu.dimension_semantics<parallel>, #tpu.dimension_semantics<arbitrary>], iteration_bounds = array<i64: 3, 1, 1, 1>, scalar_prefetch = 0 : i64, scratch_operands = 1 : i64, tpu.core_type = #tpu.core_type<tc>, window_params = [{transform_indices = @transform_0, window_bounds = array<i64: 1, 16, 32>}, {transform_indices = @transform_1, window_bounds = array<i64: 1, 32, 32>}, {transform_indices = @transform_2, window_bounds = array<i64: 1, 1, 32>}, {transform_indices = @transform_3, window_bounds = array<i64: 1, 16, 32>}]} {
    %c0_i32 = arith.constant 0 : i32
    %0 = arith.cmpi eq, %arg3, %c0_i32 : i32
    %1 = arith.extui %0 : i1 to i32
    %c0_i32_0 = arith.constant 0 : i32
    %2 = arith.cmpi ne, %1, %c0_i32_0 : i32
    scf.if %2 {
      %cst_12 = arith.constant 0.000000e+00 : f32
      %14 = vector.broadcast %cst_12 : f32 to vector<16x32xf32>
      %c0_13 = arith.constant 0 : index
      %c0_14 = arith.constant 0 : index
      %15 = vector.load %arg8[%c0_13, %c0_14] : memref<16x32xf32, #tpu.memory_space<vmem>>, vector<16x32xf32>
      tpu.vector_store %arg8[%c0_13, %c0_14], %14 {strides = array<i32>} : memref<16x32xf32, #tpu.memory_space<vmem>>, vector<16x32xf32>,
    } else {
    }
    %c0 = arith.constant 0 : index
    %c0_1 = arith.constant 0 : index
    %3 = vector.load %arg8[%c0, %c0_1] : memref<16x32xf32, #tpu.memory_space<vmem>>, vector<16x32xf32>
    %c0_2 = arith.constant 0 : index
    %c0_3 = arith.constant 0 : index
    %c0_4 = arith.constant 0 : index
    %4 = vector.load %arg4[%c0_2, %c0_3, %c0_4] : memref<1x16x32xf32, #tpu.memory_space<vmem>>, vector<1x16x32xf32>
    %5 = vector.shape_cast %4 : vector<1x16x32xf32> to vector<16x32xf32>
    %c0_5 = arith.constant 0 : index
    %c0_6 = arith.constant 0 : index
    %c0_7 = arith.constant 0 : index
    %6 = vector.load %arg5[%c0_5, %c0_6, %c0_7] : memref<1x32x32xf32, #tpu.memory_space<vmem>>, vector<1x32x32xf32>
    %7 = vector.shape_cast %6 : vector<1x32x32xf32> to vector<32x32xf32>
    %cst = arith.constant dense<0.000000e+00> : vector<16x32xf32>
    %8 = tpu.matmul %5, %7, %cst {dimension_numbers = #tpu.dot_dimension_numbers<[1], [0], [0], [1], [0, 0, 1, 1], [], []>} : vector<16x32xf32>, vector<32x32xf32>, vector<16x32xf32> -> vector<16x32xf32>
    %9 = arith.addf %3, %8 : vector<16x32xf32>
    %c0_8 = arith.constant 0 : index
    %c0_9 = arith.constant 0 : index
    %10 = vector.load %arg8[%c0_8, %c0_9] : memref<16x32xf32, #tpu.memory_space<vmem>>, vector<16x32xf32>
    tpu.vector_store %arg8[%c0_8, %c0_9], %9 {strides = array<i32>} : memref<16x32xf32, #tpu.memory_space<vmem>>, vector<16x32xf32>,
    %c0_i32_10 = arith.constant 0 : i32
    %11 = arith.cmpi eq, %arg3, %c0_i32_10 : i32
    %12 = arith.extui %11 : i1 to i32
    %c0_i32_11 = arith.constant 0 : i32
    %13 = arith.cmpi ne, %12, %c0_i32_11 : i32
    scf.if %13 {
      %c0_12 = arith.constant 0 : index
      %c0_13 = arith.constant 0 : index
      %14 = vector.load %arg8[%c0_12, %c0_13] : memref<16x32xf32, #tpu.memory_space<vmem>>, vector<16x32xf32>
      %c0_14 = arith.constant 0 : index
      %c0_15 = arith.constant 0 : index
      %c0_16 = arith.constant 0 : index
      %15 = vector.load %arg6[%c0_14, %c0_15, %c0_16] : memref<1x1x32xf32, #tpu.memory_space<vmem>>, vector<1x1x32xf32>
      %16 = vector.shape_cast %15 : vector<1x1x32xf32> to vector<1x32xf32>
      %17 = vector.broadcast %16 : vector<1x32xf32> to vector<16x32xf32>
      %18 = arith.addf %14, %17 : vector<16x32xf32>
      %c0_17 = arith.constant 0 : index
      %c0_18 = arith.constant 0 : index
      %c0_19 = arith.constant 0 : index
      %19 = vector.load %arg7[%c0_17, %c0_18, %c0_19] : memref<1x16x32xf32, #tpu.memory_space<vmem>>, vector<1x16x32xf32>
      %20 = vector.shape_cast %19 : vector<1x16x32xf32> to vector<16x32xf32>
      %21 = vector.shape_cast %18 : vector<16x32xf32> to vector<1x16x32xf32>
      tpu.vector_store %arg7[%c0_17, %c0_18, %c0_19], %21 {strides = array<i32>} : memref<1x16x32xf32, #tpu.memory_space<vmem>>, vector<1x16x32xf32>,
    } else {
    }
    return
  }
  func.func @transform_0(%arg0: i32, %arg1: i32, %arg2: i32, %arg3: i32) -> (i32, i32, i32) {
    %c0_i32 = arith.constant 0 : i32
    return %arg0, %arg1, %arg3 : i32, i32, i32
  }
  func.func @transform_1(%arg0: i32, %arg1: i32, %arg2: i32, %arg3: i32) -> (i32, i32, i32) {
    %c0_i32 = arith.constant 0 : i32
    return %arg0, %arg3, %arg2 : i32, i32, i32
  }
  func.func @transform_2(%arg0: i32, %arg1: i32, %arg2: i32, %arg3: i32) -> (i32, i32, i32) {
    %c0_i32 = arith.constant 0 : i32
    %c0_i32_0 = arith.constant 0 : i32
    return %arg0, %c0_i32, %arg2 : i32, i32, i32
  }
  func.func @transform_3(%arg0: i32, %arg1: i32, %arg2: i32, %arg3: i32) -> (i32, i32, i32) {
    %c0_i32 = arith.constant 0 : i32
    return %arg0, %arg1, %arg2 : i32, i32, i32
  }
}

module attributes {stable_mosaic.version = 11 : i64} {
  func.func @_attn_kernel(%arg0: i32, %arg1: i32, %arg2: memref<1x8x32xf32, #tpu.memory_space<vmem>>, %arg3: memref<1x8x32xf32, #tpu.memory_space<vmem>>, %arg4: memref<1x8x32xf32, #tpu.memory_space<vmem>>, %arg5: memref<1x8x32xf32, #tpu.memory_space<vmem>>, %arg6: memref<1x4x8x8xf32, #tpu.memory_space<vmem>>, %arg7: memref<8x32xf32, #tpu.memory_space<vmem>>) attributes {dimension_semantics = [#tpu.dimension_semantics<parallel>, #tpu.dimension_semantics<parallel>], iteration_bounds = array<i64: 2, 1>, scalar_prefetch = 0 : i64, scratch_operands = 1 : i64, tpu.core_type = #tpu.core_type<tc>, window_params = [{transform_indices = @transform_0, window_bounds = array<i64: 1, 8, 32>}, {transform_indices = @transform_1, window_bounds = array<i64: 1, 8, 32>}, {transform_indices = @transform_2, window_bounds = array<i64: 1, 8, 32>}, {transform_indices = @transform_3, window_bounds = array<i64: 1, 8, 32>}, {transform_indices = @transform_4, window_bounds = array<i64: 1, 4, 8, 8>}]} {
    %c0 = arith.constant 0 : index
    %c0_0 = arith.constant 0 : index
    %c0_1 = arith.constant 0 : index
    %0 = vector.load %arg2[%c0, %c0_0, %c0_1] : memref<1x8x32xf32, #tpu.memory_space<vmem>>, vector<1x8x32xf32>
    %1 = vector.shape_cast %0 : vector<1x8x32xf32> to vector<8x32xf32>
    %cst = arith.constant 0.353553385 : f32
    %2 = vector.broadcast %cst : f32 to vector<8x32xf32>
    %3 = arith.mulf %1, %2 : vector<8x32xf32>
    %c0_2 = arith.constant 0 : index
    %c0_3 = arith.constant 0 : index
    %c0_4 = arith.constant 0 : index
    %4 = vector.load %arg3[%c0_2, %c0_3, %c0_4] : memref<1x8x32xf32, #tpu.memory_space<vmem>>, vector<1x8x32xf32>
    %5 = vector.shape_cast %4 : vector<1x8x32xf32> to vector<8x32xf32>
    %c0_5 = arith.constant 0 : index
    %c0_6 = arith.constant 0 : index
    %c0_7 = arith.constant 0 : index
    %6 = vector.load %arg4[%c0_5, %c0_6, %c0_7] : memref<1x8x32xf32, #tpu.memory_space<vmem>>, vector<1x8x32xf32>
    %7 = vector.shape_cast %6 : vector<1x8x32xf32> to vector<8x32xf32>
    %8 = vector.extract_strided_slice %3 {offsets = [0, 0], sizes = [8, 8], strides = [1, 1]} : vector<8x32xf32> to vector<8x8xf32>
    %9 = vector.extract_strided_slice %5 {offsets = [0, 0], sizes = [8, 8], strides = [1, 1]} : vector<8x32xf32> to vector<8x8xf32>
    %cst_8 = arith.constant dense<0.000000e+00> : vector<8x8xf32>
    %10 = tpu.matmul %8, %9, %cst_8 {dimension_numbers = #tpu.dot_dimension_numbers<[1], [1], [0], [0], [0, 0, 1, 0], [], []>} : vector<8x8xf32>, vector<8x8xf32>, vector<8x8xf32> -> vector<8x8xf32>
    %cst_9 = arith.constant dense<0xFF800000> : vector<8xf32>
    %11 = vector.multi_reduction <maximumf>, %10, %cst_9 [1] : vector<8x8xf32> to vector<8xf32>
    %12 = vector.shape_cast %11 : vector<8xf32> to vector<8x1xf32>
    %13 = vector.broadcast %12 : vector<8x1xf32> to vector<8x8xf32>
    %14 = arith.subf %10, %13 : vector<8x8xf32>
    %15 = math.exp %14 : vector<8x8xf32>
    %cst_10 = arith.constant dense<0.000000e+00> : vector<8xf32>
    %16 = vector.multi_reduction <add>, %15, %cst_10 [1] : vector<8x8xf32> to vector<8xf32>
    %17 = vector.shape_cast %16 : vector<8xf32> to vector<8x1xf32>
    %18 = tpu.reciprocal %17 {approx = true} : vector<8x1xf32> -> vector<8x1xf32>
    %19 = vector.broadcast %18 : vector<8x1xf32> to vector<8x8xf32>
    %20 = arith.mulf %15, %19 : vector<8x8xf32>
    %c0_11 = arith.constant 0 : index
    %c0_12 = arith.constant 0 : index
    %c0_13 = arith.constant 0 : index
    %c0_14 = arith.constant 0 : index
    %21 = vector.load %arg6[%c0_11, %c0_12, %c0_13, %c0_14] : memref<1x4x8x8xf32, #tpu.memory_space<vmem>>, vector<1x1x8x8xf32>
    %22 = vector.shape_cast %21 : vector<1x1x8x8xf32> to vector<8x8xf32>
    %23 = vector.shape_cast %20 : vector<8x8xf32> to vector<1x1x8x8xf32>
    tpu.vector_store %arg6[%c0_11, %c0_12, %c0_13, %c0_14], %23 {strides = array<i32>} : memref<1x4x8x8xf32, #tpu.memory_space<vmem>>, vector<1x1x8x8xf32>,
    %24 = vector.extract_strided_slice %7 {offsets = [0, 0], sizes = [8, 8], strides = [1, 1]} : vector<8x32xf32> to vector<8x8xf32>
    %cst_15 = arith.constant dense<0.000000e+00> : vector<8x8xf32>
    %25 = tpu.matmul %20, %24, %cst_15 {dimension_numbers = #tpu.dot_dimension_numbers<[1], [0], [0], [1], [0, 0, 1, 1], [], []>} : vector<8x8xf32>, vector<8x8xf32>, vector<8x8xf32> -> vector<8x8xf32>
    %c0_16 = arith.constant 0 : index
    %c0_17 = arith.constant 0 : index
    %26 = vector.load %arg7[%c0_16, %c0_17] : memref<8x32xf32, #tpu.memory_space<vmem>>, vector<8x8xf32>
    tpu.vector_store %arg7[%c0_16, %c0_17], %25 {strides = array<i32>} : memref<8x32xf32, #tpu.memory_space<vmem>>, vector<8x8xf32>,
    %27 = vector.extract_strided_slice %3 {offsets = [0, 8], sizes = [8, 8], strides = [1, 1]} : vector<8x32xf32> to vector<8x8xf32>
    %28 = vector.extract_strided_slice %5 {offsets = [0, 8], sizes = [8, 8], strides = [1, 1]} : vector<8x32xf32> to vector<8x8xf32>
    %cst_18 = arith.constant dense<0.000000e+00> : vector<8x8xf32>
    %29 = tpu.matmul %27, %28, %cst_18 {dimension_numbers = #tpu.dot_dimension_numbers<[1], [1], [0], [0], [0, 0, 1, 0], [], []>} : vector<8x8xf32>, vector<8x8xf32>, vector<8x8xf32> -> vector<8x8xf32>
    %cst_19 = arith.constant dense<0xFF800000> : vector<8xf32>
    %30 = vector.multi_reduction <maximumf>, %29, %cst_19 [1] : vector<8x8xf32> to vector<8xf32>
    %31 = vector.shape_cast %30 : vector<8xf32> to vector<8x1xf32>
    %32 = vector.broadcast %31 : vector<8x1xf32> to vector<8x8xf32>
    %33 = arith.subf %29, %32 : vector<8x8xf32>
    %34 = math.exp %33 : vector<8x8xf32>
    %cst_20 = arith.constant dense<0.000000e+00> : vector<8xf32>
    %35 = vector.multi_reduction <add>, %34, %cst_20 [1] : vector<8x8xf32> to vector<8xf32>
    %36 = vector.shape_cast %35 : vector<8xf32> to vector<8x1xf32>
    %37 = tpu.reciprocal %36 {approx = true} : vector<8x1xf32> -> vector<8x1xf32>
    %38 = vector.broadcast %37 : vector<8x1xf32> to vector<8x8xf32>
    %39 = arith.mulf %34, %38 : vector<8x8xf32>
    %c0_21 = arith.constant 0 : index
    %c1 = arith.constant 1 : index
    %c0_22 = arith.constant 0 : index
    %c0_23 = arith.constant 0 : index
    %40 = vector.load %arg6[%c0_21, %c1, %c0_22, %c0_23] : memref<1x4x8x8xf32, #tpu.memory_space<vmem>>, vector<1x1x8x8xf32>
    %41 = vector.shape_cast %40 : vector<1x1x8x8xf32> to vector<8x8xf32>
    %42 = vector.shape_cast %39 : vector<8x8xf32> to vector<1x1x8x8xf32>
    tpu.vector_store %arg6[%c0_21, %c1, %c0_22, %c0_23], %42 {strides = array<i32>} : memref<1x4x8x8xf32, #tpu.memory_space<vmem>>, vector<1x1x8x8xf32>,
    %43 = vector.extract_strided_slice %7 {offsets = [0, 8], sizes = [8, 8], strides = [1, 1]} : vector<8x32xf32> to vector<8x8xf32>
    %cst_24 = arith.constant dense<0.000000e+00> : vector<8x8xf32>
    %44 = tpu.matmul %39, %43, %cst_24 {dimension_numbers = #tpu.dot_dimension_numbers<[1], [0], [0], [1], [0, 0, 1, 1], [], []>} : vector<8x8xf32>, vector<8x8xf32>, vector<8x8xf32> -> vector<8x8xf32>
    %c0_25 = arith.constant 0 : index
    %c8 = arith.constant 8 : index
    %45 = vector.load %arg7[%c0_25, %c8] : memref<8x32xf32, #tpu.memory_space<vmem>>, vector<8x8xf32>
    tpu.vector_store %arg7[%c0_25, %c8], %44 {strides = array<i32>} : memref<8x32xf32, #tpu.memory_space<vmem>>, vector<8x8xf32>,
    %46 = vector.extract_strided_slice %3 {offsets = [0, 16], sizes = [8, 8], strides = [1, 1]} : vector<8x32xf32> to vector<8x8xf32>
    %47 = vector.extract_strided_slice %5 {offsets = [0, 16], sizes = [8, 8], strides = [1, 1]} : vector<8x32xf32> to vector<8x8xf32>
    %cst_26 = arith.constant dense<0.000000e+00> : vector<8x8xf32>
    %48 = tpu.matmul %46, %47, %cst_26 {dimension_numbers = #tpu.dot_dimension_numbers<[1], [1], [0], [0], [0, 0, 1, 0], [], []>} : vector<8x8xf32>, vector<8x8xf32>, vector<8x8xf32> -> vector<8x8xf32>
    %cst_27 = arith.constant dense<0xFF800000> : vector<8xf32>
    %49 = vector.multi_reduction <maximumf>, %48, %cst_27 [1] : vector<8x8xf32> to vector<8xf32>
    %50 = vector.shape_cast %49 : vector<8xf32> to vector<8x1xf32>
    %51 = vector.broadcast %50 : vector<8x1xf32> to vector<8x8xf32>
    %52 = arith.subf %48, %51 : vector<8x8xf32>
    %53 = math.exp %52 : vector<8x8xf32>
    %cst_28 = arith.constant dense<0.000000e+00> : vector<8xf32>
    %54 = vector.multi_reduction <add>, %53, %cst_28 [1] : vector<8x8xf32> to vector<8xf32>
    %55 = vector.shape_cast %54 : vector<8xf32> to vector<8x1xf32>
    %56 = tpu.reciprocal %55 {approx = true} : vector<8x1xf32> -> vector<8x1xf32>
    %57 = vector.broadcast %56 : vector<8x1xf32> to vector<8x8xf32>
    %58 = arith.mulf %53, %57 : vector<8x8xf32>
    %c0_29 = arith.constant 0 : index
    %c2 = arith.constant 2 : index
    %c0_30 = arith.constant 0 : index
    %c0_31 = arith.constant 0 : index
    %59 = vector.load %arg6[%c0_29, %c2, %c0_30, %c0_31] : memref<1x4x8x8xf32, #tpu.memory_space<vmem>>, vector<1x1x8x8xf32>
    %60 = vector.shape_cast %59 : vector<1x1x8x8xf32> to vector<8x8xf32>
    %61 = vector.shape_cast %58 : vector<8x8xf32> to vector<1x1x8x8xf32>
    tpu.vector_store %arg6[%c0_29, %c2, %c0_30, %c0_31], %61 {strides = array<i32>} : memref<1x4x8x8xf32, #tpu.memory_space<vmem>>, vector<1x1x8x8xf32>,
    %62 = vector.extract_strided_slice %7 {offsets = [0, 16], sizes = [8, 8], strides = [1, 1]} : vector<8x32xf32> to vector<8x8xf32>
    %cst_32 = arith.constant dense<0.000000e+00> : vector<8x8xf32>
    %63 = tpu.matmul %58, %62, %cst_32 {dimension_numbers = #tpu.dot_dimension_numbers<[1], [0], [0], [1], [0, 0, 1, 1], [], []>} : vector<8x8xf32>, vector<8x8xf32>, vector<8x8xf32> -> vector<8x8xf32>
    %c0_33 = arith.constant 0 : index
    %c16 = arith.constant 16 : index
    %64 = vector.load %arg7[%c0_33, %c16] : memref<8x32xf32, #tpu.memory_space<vmem>>, vector<8x8xf32>
    tpu.vector_store %arg7[%c0_33, %c16], %63 {strides = array<i32>} : memref<8x32xf32, #tpu.memory_space<vmem>>, vector<8x8xf32>,
    %65 = vector.extract_strided_slice %3 {offsets = [0, 24], sizes = [8, 8], strides = [1, 1]} : vector<8x32xf32> to vector<8x8xf32>
    %66 = vector.extract_strided_slice %5 {offsets = [0, 24], sizes = [8, 8], strides = [1, 1]} : vector<8x32xf32> to vector<8x8xf32>
    %cst_34 = arith.constant dense<0.000000e+00> : vector<8x8xf32>
    %67 = tpu.matmul %65, %66, %cst_34 {dimension_numbers = #tpu.dot_dimension_numbers<[1], [1], [0], [0], [0, 0, 1, 0], [], []>} : vector<8x8xf32>, vector<8x8xf32>, vector<8x8xf32> -> vector<8x8xf32>
    %cst_35 = arith.constant dense<0xFF800000> : vector<8xf32>
    %68 = vector.multi_reduction <maximumf>, %67, %cst_35 [1] : vector<8x8xf32> to vector<8xf32>
    %69 = vector.shape_cast %68 : vector<8xf32> to vector<8x1xf32>
    %70 = vector.broadcast %69 : vector<8x1xf32> to vector<8x8xf32>
    %71 = arith.subf %67, %70 : vector<8x8xf32>
    %72 = math.exp %71 : vector<8x8xf32>
    %cst_36 = arith.constant dense<0.000000e+00> : vector<8xf32>
    %73 = vector.multi_reduction <add>, %72, %cst_36 [1] : vector<8x8xf32> to vector<8xf32>
    %74 = vector.shape_cast %73 : vector<8xf32> to vector<8x1xf32>
    %75 = tpu.reciprocal %74 {approx = true} : vector<8x1xf32> -> vector<8x1xf32>
    %76 = vector.broadcast %75 : vector<8x1xf32> to vector<8x8xf32>
    %77 = arith.mulf %72, %76 : vector<8x8xf32>
    %c0_37 = arith.constant 0 : index
    %c3 = arith.constant 3 : index
    %c0_38 = arith.constant 0 : index
    %c0_39 = arith.constant 0 : index
    %78 = vector.load %arg6[%c0_37, %c3, %c0_38, %c0_39] : memref<1x4x8x8xf32, #tpu.memory_space<vmem>>, vector<1x1x8x8xf32>
    %79 = vector.shape_cast %78 : vector<1x1x8x8xf32> to vector<8x8xf32>
    %80 = vector.shape_cast %77 : vector<8x8xf32> to vector<1x1x8x8xf32>
    tpu.vector_store %arg6[%c0_37, %c3, %c0_38, %c0_39], %80 {strides = array<i32>} : memref<1x4x8x8xf32, #tpu.memory_space<vmem>>, vector<1x1x8x8xf32>,
    %81 = vector.extract_strided_slice %7 {offsets = [0, 24], sizes = [8, 8], strides = [1, 1]} : vector<8x32xf32> to vector<8x8xf32>
    %cst_40 = arith.constant dense<0.000000e+00> : vector<8x8xf32>
    %82 = tpu.matmul %77, %81, %cst_40 {dimension_numbers = #tpu.dot_dimension_numbers<[1], [0], [0], [1], [0, 0, 1, 1], [], []>} : vector<8x8xf32>, vector<8x8xf32>, vector<8x8xf32> -> vector<8x8xf32>
    %c0_41 = arith.constant 0 : index
    %c24 = arith.constant 24 : index
    %83 = vector.load %arg7[%c0_41, %c24] : memref<8x32xf32, #tpu.memory_space<vmem>>, vector<8x8xf32>
    tpu.vector_store %arg7[%c0_41, %c24], %82 {strides = array<i32>} : memref<8x32xf32, #tpu.memory_space<vmem>>, vector<8x8xf32>,
    %c0_42 = arith.constant 0 : index
    %c0_43 = arith.constant 0 : index
    %84 = vector.load %arg7[%c0_42, %c0_43] : memref<8x32xf32, #tpu.memory_space<vmem>>, vector<8x32xf32>
    %c0_44 = arith.constant 0 : index
    %c0_45 = arith.constant 0 : index
    %c0_46 = arith.constant 0 : index
    %85 = vector.load %arg5[%c0_44, %c0_45, %c0_46] : memref<1x8x32xf32, #tpu.memory_space<vmem>>, vector<1x8x32xf32>
    %86 = vector.shape_cast %85 : vector<1x8x32xf32> to vector<8x32xf32>
    %87 = vector.shape_cast %84 : vector<8x32xf32> to vector<1x8x32xf32>
    tpu.vector_store %arg5[%c0_44, %c0_45, %c0_46], %87 {strides = array<i32>} : memref<1x8x32xf32, #tpu.memory_space<vmem>>, vector<1x8x32xf32>,
    return
  }
  func.func @transform_0(%arg0: i32, %arg1: i32) -> (i32, i32, i32) {
    %c0_i32 = arith.constant 0 : i32
    %c0_i32_0 = arith.constant 0 : i32
    return %arg0, %arg1, %c0_i32 : i32, i32, i32
  }
  func.func @transform_1(%arg0: i32, %arg1: i32) -> (i32, i32, i32) {
    %c0_i32 = arith.constant 0 : i32
    %c0_i32_0 = arith.constant 0 : i32
    %c0_i32_1 = arith.constant 0 : i32
    return %arg0, %c0_i32, %c0_i32_0 : i32, i32, i32
  }
  func.func @transform_2(%arg0: i32, %arg1: i32) -> (i32, i32, i32) {
    %c0_i32 = arith.constant 0 : i32
    %c0_i32_0 = arith.constant 0 : i32
    %c0_i32_1 = arith.constant 0 : i32
    return %arg0, %c0_i32, %c0_i32_0 : i32, i32, i32
  }
  func.func @transform_3(%arg0: i32, %arg1: i32) -> (i32, i32, i32) {
    %c0_i32 = arith.constant 0 : i32
    %c0_i32_0 = arith.constant 0 : i32
    return %arg0, %arg1, %c0_i32 : i32, i32, i32
  }
  func.func @transform_4(%arg0: i32, %arg1: i32) -> (i32, i32, i32, i32) {
    %c0_i32 = arith.constant 0 : i32
    %c0_i32_0 = arith.constant 0 : i32
    %c0_i32_1 = arith.constant 0 : i32
    return %arg0, %c0_i32, %arg1, %c0_i32_0 : i32, i32, i32, i32
  }
}

module attributes {stable_mosaic.version = 11 : i64} {
  func.func @_linear_kernel(%arg0: i32, %arg1: i32, %arg2: i32, %arg3: i32, %arg4: memref<1x16x32xf32, #tpu.memory_space<vmem>>, %arg5: memref<1x32x32xf32, #tpu.memory_space<vmem>>, %arg6: memref<1x1x32xf32, #tpu.memory_space<vmem>>, %arg7: memref<1x16x32xf32, #tpu.memory_space<vmem>>, %arg8: memref<16x32xf32, #tpu.memory_space<vmem>>) attributes {dimension_semantics = [#tpu.dimension_semantics<parallel>, #tpu.dimension_semantics<parallel>, #tpu.dimension_semantics<parallel>, #tpu.dimension_semantics<arbitrary>], iteration_bounds = array<i64: 1, 1, 1, 1>, scalar_prefetch = 0 : i64, scratch_operands = 1 : i64, tpu.core_type = #tpu.core_type<tc>, window_params = [{transform_indices = @transform_0, window_bounds = array<i64: 1, 16, 32>}, {transform_indices = @transform_1, window_bounds = array<i64: 1, 32, 32>}, {transform_indices = @transform_2, window_bounds = array<i64: 1, 1, 32>}, {transform_indices = @transform_3, window_bounds = array<i64: 1, 16, 32>}]} {
    %c0_i32 = arith.constant 0 : i32
    %0 = arith.cmpi eq, %arg3, %c0_i32 : i32
    %1 = arith.extui %0 : i1 to i32
    %c0_i32_0 = arith.constant 0 : i32
    %2 = arith.cmpi ne, %1, %c0_i32_0 : i32
    scf.if %2 {
      %cst_12 = arith.constant 0.000000e+00 : f32
      %14 = vector.broadcast %cst_12 : f32 to vector<16x32xf32>
      %c0_13 = arith.constant 0 : index
      %c0_14 = arith.constant 0 : index
      %15 = vector.load %arg8[%c0_13, %c0_14] : memref<16x32xf32, #tpu.memory_space<vmem>>, vector<16x32xf32>
      tpu.vector_store %arg8[%c0_13, %c0_14], %14 {strides = array<i32>} : memref<16x32xf32, #tpu.memory_space<vmem>>, vector<16x32xf32>,
    } else {
    }
    %c0 = arith.constant 0 : index
    %c0_1 = arith.constant 0 : index
    %3 = vector.load %arg8[%c0, %c0_1] : memref<16x32xf32, #tpu.memory_space<vmem>>, vector<16x32xf32>
    %c0_2 = arith.constant 0 : index
    %c0_3 = arith.constant 0 : index
    %c0_4 = arith.constant 0 : index
    %4 = vector.load %arg4[%c0_2, %c0_3, %c0_4] : memref<1x16x32xf32, #tpu.memory_space<vmem>>, vector<1x16x32xf32>
    %5 = vector.shape_cast %4 : vector<1x16x32xf32> to vector<16x32xf32>
    %c0_5 = arith.constant 0 : index
    %c0_6 = arith.constant 0 : index
    %c0_7 = arith.constant 0 : index
    %6 = vector.load %arg5[%c0_5, %c0_6, %c0_7] : memref<1x32x32xf32, #tpu.memory_space<vmem>>, vector<1x32x32xf32>
    %7 = vector.shape_cast %6 : vector<1x32x32xf32> to vector<32x32xf32>
    %cst = arith.constant dense<0.000000e+00> : vector<16x32xf32>
    %8 = tpu.matmul %5, %7, %cst {dimension_numbers = #tpu.dot_dimension_numbers<[1], [0], [0], [1], [0, 0, 1, 1], [], []>} : vector<16x32xf32>, vector<32x32xf32>, vector<16x32xf32> -> vector<16x32xf32>
    %9 = arith.addf %3, %8 : vector<16x32xf32>
    %c0_8 = arith.constant 0 : index
    %c0_9 = arith.constant 0 : index
    %10 = vector.load %arg8[%c0_8, %c0_9] : memref<16x32xf32, #tpu.memory_space<vmem>>, vector<16x32xf32>
    tpu.vector_store %arg8[%c0_8, %c0_9], %9 {strides = array<i32>} : memref<16x32xf32, #tpu.memory_space<vmem>>, vector<16x32xf32>,
    %c0_i32_10 = arith.constant 0 : i32
    %11 = arith.cmpi eq, %arg3, %c0_i32_10 : i32
    %12 = arith.extui %11 : i1 to i32
    %c0_i32_11 = arith.constant 0 : i32
    %13 = arith.cmpi ne, %12, %c0_i32_11 : i32
    scf.if %13 {
      %c0_12 = arith.constant 0 : index
      %c0_13 = arith.constant 0 : index
      %14 = vector.load %arg8[%c0_12, %c0_13] : memref<16x32xf32, #tpu.memory_space<vmem>>, vector<16x32xf32>
      %c0_14 = arith.constant 0 : index
      %c0_15 = arith.constant 0 : index
      %c0_16 = arith.constant 0 : index
      %15 = vector.load %arg6[%c0_14, %c0_15, %c0_16] : memref<1x1x32xf32, #tpu.memory_space<vmem>>, vector<1x1x32xf32>
      %16 = vector.shape_cast %15 : vector<1x1x32xf32> to vector<1x32xf32>
      %17 = vector.broadcast %16 : vector<1x32xf32> to vector<16x32xf32>
      %18 = arith.addf %14, %17 : vector<16x32xf32>
      %c0_17 = arith.constant 0 : index
      %c0_18 = arith.constant 0 : index
      %c0_19 = arith.constant 0 : index
      %19 = vector.load %arg7[%c0_17, %c0_18, %c0_19] : memref<1x16x32xf32, #tpu.memory_space<vmem>>, vector<1x16x32xf32>
      %20 = vector.shape_cast %19 : vector<1x16x32xf32> to vector<16x32xf32>
      %21 = vector.shape_cast %18 : vector<16x32xf32> to vector<1x16x32xf32>
      tpu.vector_store %arg7[%c0_17, %c0_18, %c0_19], %21 {strides = array<i32>} : memref<1x16x32xf32, #tpu.memory_space<vmem>>, vector<1x16x32xf32>,
    } else {
    }
    return
  }
  func.func @transform_0(%arg0: i32, %arg1: i32, %arg2: i32, %arg3: i32) -> (i32, i32, i32) {
    %c0_i32 = arith.constant 0 : i32
    return %arg0, %arg1, %arg3 : i32, i32, i32
  }
  func.func @transform_1(%arg0: i32, %arg1: i32, %arg2: i32, %arg3: i32) -> (i32, i32, i32) {
    %c0_i32 = arith.constant 0 : i32
    return %arg0, %arg3, %arg2 : i32, i32, i32
  }
  func.func @transform_2(%arg0: i32, %arg1: i32, %arg2: i32, %arg3: i32) -> (i32, i32, i32) {
    %c0_i32 = arith.constant 0 : i32
    %c0_i32_0 = arith.constant 0 : i32
    return %arg0, %c0_i32, %arg2 : i32, i32, i32
  }
  func.func @transform_3(%arg0: i32, %arg1: i32, %arg2: i32, %arg3: i32) -> (i32, i32, i32) {
    %c0_i32 = arith.constant 0 : i32
    return %arg0, %arg1, %arg2 : i32, i32, i32
  }
}

</mosaic_0001>

<bundles_post_ra>
// kernel: multi_headed_attention.3
= control target key start
LH: loop header
LB: loop body
LE: loop exit
PB: predicated region body
PF: predicated region fallthrough
CT: control target
= control target key end

     0   :  { %s685_s12 = smov 0   ;;  %s687_s13 = smov 0   ;;  %s737_s0 = inlined_call_operand.vmem [shape: f32[3,16,32], index: 0, kind: input, shape index: {}]   ;;  %s738_s1 = inlined_call_operand.vmem [shape: f32[3,32,32], index: 1, kind: input, shape index: {}]   ;;  %s739_s2 = inlined_call_operand.vmem [shape: f32[3,1,32], index: 2, kind: input, shape index: {}]   ;;  %s740_s3 = inlined_call_operand.vmem [shape: f32[3,16,32], index: 3, kind: output, shape index: {}]  }
   0x1   :  { %s689_s14 = smov 0  }
   0x2 LB: > { %s39_s15 = sadd.s32 1, %s658_s13  ;;  %p575_p0 = scmp.ge.s32.totalorder %s662_s14, 1  ;;  %s662_s14 = sphi %s689_s14, %s13_s14   ;;  %s658_s13 = sphi %s687_s13, %s742_s13   ;;  %s654_s12 = sphi %s685_s12, %s741_s12  }
   0x3   : > { %p41_p1 = scmp.ge.s32.totalorder %s39_s15, 3  ;;  %p214_p2 = scmp.lt.s32.totalorder %s662_s14, 4 }
   0x5   : > { %s744_s15 = smov (%p41_p1, %s39_s15), 0  ;;  %p215_p3 = pnand %p575_p0, %p214_p2 }
   0x6   : > { %p271_p4 = scmp.lt.s32.totalorder (!%p215_p3), %s654_s12, 2  ;;  %vm319_vm0 = vcmask (!%p215_p3), 261120   ;;  %v664_v0 = vmov (!%p215_p3), 0.0  }
   0x7   : > { %218 = sbr.rel (%p215_p3) target bundleno = 254 (0xfe), region = 32  ;;  %321 = vst.msk [vmem:[#allocation2 + $0x8] sm:$0xff] (!%p215_p3), %vm319_vm0, %v664_v0  ;;  %320 = vst.msk [vmem:[#allocation2] sm:$0xff] (!%p215_p3), %vm319_vm0, %v664_v0 }
   0xe   : > { %s746_s12 = smov (!%p271_p4, %s654_s12), 2  ;;  %v323_v9 = vld [vmem:[#allocation2 + $0x8] sm:$0xff]  ;;  %v322_v10 = vld [vmem:[#allocation2] sm:$0xff] }
   0xf   : > { %s588_s16 = sshll.u32 %s746_s12, 5  ;;  %s587_s20 = sshll.u32 %s746_s12, 4 }
  0x10   : > { %s294_s19 = scalar_lea.vmem %s738_s1, %s588_s16  ;;  %s281_s23 = scalar_lea.vmem %s737_s0, %s587_s20 }
  0x11   : > { %v326_v1 = vld [vmem:[%s294_s19] sm:$0xff]  ;;  %v327_v2 = vld [vmem:[%s294_s19 + $0x8] sm:$0xff]  ;;  %v328_v3 = vld [vmem:[%s294_s19 + $0x10] sm:$0xff]  ;;  %s301_s26 = scalar_lea.vmem %s739_s2, %s746_s12  ;;  %s313_s29 = scalar_lea.vmem %s740_s3, %s587_s20 }
  0x12   : > { %v607_v4 = vpack.c.bf16 %v327_v2, %v326_v1  ;;  %v329_v5 = vld [vmem:[%s294_s19 + $0x18] sm:$0xff]  ;;  %v324_v6 = vld [vmem:[%s281_s23] sm:$0xff]  ;;  %v325_v8 = vld [vmem:[%s281_s23 + $0x8] sm:$0xff] }
  0x13   : > { %v611_v7 = vpack.c.bf16 %v329_v5, %v328_v3  ;;  %604 = vmatprep.mubr.msk.f32.mxu0 %vm319_vm0, %v324_v6  ;;  %v584_v15 = vld [vmem:[%s301_s26] ss:$0 sm:$0xff] }
  0x14   : > { %608 = vmatprep.subr.bf16.mxu0 %v607_v4 }
  0x15   : > { %610 = vmatpush3.bf16.msra.mxu0 %v607_v4 }
  0x16   : > { %612 = vmatprep.subr.bf16.mxu0 %v611_v7 }
  0x19   : > { %614 = vmatpush3.bf16.msra.mxu0 %v611_v7 }
  0x1c   : > { %605 = vmatmul.mubr.msk.f32.vlgmr.msra.gmra.mrb[0].mxu0 %vm319_vm0, %v325_v8 }
  0xef   : > { %v606_v11 = vpop.f32.mrb[0].mxu0 }
  0xf0   : > { %v413_v12 = vadd.f32 %v606_v11, %v323_v9  ;;  %v403_v13 = vpop.f32.mrb[1].mxu0 }
  0xf1   : > { %v412_v14 = vadd.f32 %v403_v13, %v322_v10 }
  0xf2   : > { %415 = vst.msk [vmem:[#allocation2 + $0x8] sm:$0xff] %vm319_vm0, %v413_v12 }
  0xf3   : > { %414 = vst.msk [vmem:[#allocation2] sm:$0xff] %vm319_vm0, %v412_v14 }
  0xf9   : > { %v420_v16 = vld [vmem:[#allocation2 + $0x8] sm:$0xff] }
  0xfa   : > { %v429_v17 = vadd.f32 %v584_v15, %v420_v16  ;;  %v419_v18 = vld [vmem:[#allocation2] sm:$0xff] }
  0xfb   : > { %v428_v19 = vadd.f32 %v584_v15, %v419_v18 }
  0xfc   : > { %431 = vst.msk [vmem:[%s313_s29 + $0x8] sm:$0xff] %vm319_vm0, %v429_v17 }
  0xfd   : > { %430 = vst.msk [vmem:[%s313_s29] sm:$0xff] %vm319_vm0, %v428_v19 }
  0xfe PF: > { %s13_s14 = sadd.s32 1, %s662_s14   ;;  %s741_s12 = smov %s658_s13 }
  0xff   : > { %p10_p5 = scmp.ge.s32.totalorder %s13_s14, 5   ;;  %s742_s13 = smov %s744_s15 }
 0x101   :  { %12 = sbr.rel (!%p10_p5) target bundleno = 2 (0x2), region = 76 }

// kernel: multi_headed_attention.5
= control target key start
LH: loop header
LB: loop body
LE: loop exit
PB: predicated region body
PF: predicated region fallthrough
CT: control target
= control target key end

     0   :  { %vm19_vm0 = vcmask 261120   ;;  %v204_v6 = vmov 0.0   ;;  %s269_s0 = inlined_call_operand.vmem [shape: f32[1,16,32], index: 0, kind: input, shape index: {}]   ;;  %s270_s1 = inlined_call_operand.vmem [shape: f32[1,32,32], index: 1, kind: input, shape index: {}]   ;;  %s271_s2 = inlined_call_operand.vmem [shape: f32[1,1,32], index: 2, kind: input, shape index: {}]   ;;  %s272_s3 = inlined_call_operand.hbm [shape: f32[1,16,32], index: 3, kind: output, shape index: {}]  }
   0x1   :  { %v26_v0 = vld [vmem:[%s270_s1] sm:$0xff]  ;;  %v27_v1 = vld [vmem:[%s270_s1 + $0x8] sm:$0xff]  ;;  %v28_v2 = vld [vmem:[%s270_s1 + $0x10] sm:$0xff]  ;;  %21 = vst.msk [vmem:[#allocation2 + $0x8] sm:$0xff] %vm19_vm0, %v204_v6 }
   0x2   :  { %v168_v3 = vpack.c.bf16 %v27_v1, %v26_v0  ;;  %v29_v4 = vld [vmem:[%s270_s1 + $0x18] sm:$0xff]  ;;  %v24_v5 = vld [vmem:[%s269_s0] sm:$0xff]  ;;  %20 = vst.msk [vmem:[#allocation2] sm:$0xff] %vm19_vm0, %v204_v6 }
   0x3   :  { %v172_v7 = vpack.c.bf16 %v29_v4, %v28_v2  ;;  %165 = vmatprep.mubr.msk.f32.mxu0 %vm19_vm0, %v24_v5 }
   0x4   :  { %8 = vsyncpa [#allocation4], 0  ;;  %169 = vmatprep.subr.bf16.mxu0 %v168_v3  ;;  %v25_v8 = vld [vmem:[%s269_s0 + $0x8] sm:$0xff]  ;;  %v150_v15 = vld [vmem:[%s271_s2] ss:$0 sm:$0xff]  ;;  %s205_s25 = smov [#allocation3]  }
   0x5   :  { %171 = vmatpush3.bf16.msra.mxu0 %v168_v3  ;;  %s137_s26 = sshll.u32 %s205_s25, 4  ;;  %s138_s26 = int_to_ptr.vmem [resolvable:$true] %s137_s26 }
   0x6   :  { %173 = vmatprep.subr.bf16.mxu0 %v172_v7  ;;  %s180_s0 = scalar_lea.vmem %s138_s26, 256  ;;  %p185_p1 = scmp.lt.s32.totalorder %s138_s26, %s138_s26 }
   0x7   :  { %p181_p0 = scmp.ne.s32.totalorder %s138_s26, %s180_s0  ;;  %p186_p2 = scmp.lt.s32.totalorder %s180_s0, %s180_s0 }
   0x8   :  { %v23_v9 = vld [vmem:[#allocation2 + $0x8] sm:$0xff] }
   0x9   :  { %175 = vmatpush3.bf16.msra.mxu0 %v172_v7  ;;  %v22_v10 = vld [vmem:[#allocation2] sm:$0xff]  ;;  %p187_p3 = por %p186_p2, %p185_p1 }
   0xb   :  { %p188_p4 = pnand %p187_p3, %p181_p0 }
   0xc   :  { %166 = vmatmul.mubr.msk.f32.vlgmr.msra.gmra.mrb[0].mxu0 %vm19_vm0, %v25_v8 }
  0xdf   :  { %v167_v11 = vpop.f32.mrb[0].mxu0 }
  0xe0   :  { %v113_v12 = vadd.f32 %v167_v11, %v23_v9  ;;  %v103_v13 = vpop.f32.mrb[1].mxu0 }
  0xe1   :  { %v112_v14 = vadd.f32 %v103_v13, %v22_v10 }
  0xe2   :  { %115 = vst.msk [vmem:[#allocation2 + $0x8] sm:$0xff] %vm19_vm0, %v113_v12 }
  0xe3   :  { %114 = vst.msk [vmem:[#allocation2] sm:$0xff] %vm19_vm0, %v112_v14 }
  0xe9   :  { %v120_v16 = vld [vmem:[#allocation2 + $0x8] sm:$0xff] }
  0xea   :  { %v119_v17 = vld [vmem:[#allocation2] sm:$0xff]  ;;  %v129_v18 = vadd.f32 %v150_v15, %v120_v16 }
  0xeb   :  { %v128_v19 = vadd.f32 %v150_v15, %v119_v17 }
  0xec   :  { %131 = vst.msk [vmem:[#allocation3 + $0x8] sm:$0xff] %vm19_vm0, %v129_v18 }
  0xed   :  { %130 = vst.msk [vmem:[#allocation3] sm:$0xff] %vm19_vm0, %v128_v19 }
  0xee   :  { %191 = shalt.err (!%p188_p4)
}
  0xef   :  { %s192_s28 = scalar_lea.hbm %s272_s3, 256 }
  0xf0   :  { %p193_p5 = scmp.ne.s32.totalorder %s272_s3, %s192_s28  ;;  %p196_p6 = scmp.lt.u32.totalorder %s192_s28, %s272_s3 }
  0xf2   :  { %p198_p7 = pnand %p196_p6, %p193_p5 }
  0xf4   :  { %201 = shalt.err (!%p198_p7)
}
  0xf5   :  { %s206_s6 = smov 128   ;;  %s207_s7 = smov 8  }
  0xf6   :  { %143 = dma.vmem_to_hbm [thread:$0]  %s138_s26, 256, %s272_s3, [#allocation4], %s206_s6, %s206_s6, %s207_s7  }
  0xf7   :  { %202 = dma.done.wait [#allocation4], 256  }
  0xf8   :  { %203 = vsyncadd [#allocation4], 4294967040 }
  0xf9   :  { %147 = vsyncpa [#allocation4], 1 }

// kernel: multi_headed_attention.4
= control target key start
LH: loop header
LB: loop body
LE: loop exit
PB: predicated region body
PF: predicated region fallthrough
CT: control target
= control target key end

     0   :  { %10 = vsyncpa [#allocation4], 0  ;;  %s1605_s0 = inlined_call_operand.vmem [shape: f32[2,8,32], index: 0, kind: input, shape index: {}]   ;;  %s1606_s1 = inlined_call_operand.vmem [shape: f32[2,8,32], index: 1, kind: input, shape index: {}]   ;;  %s1607_s2 = inlined_call_operand.vmem [shape: f32[2,8,32], index: 2, kind: input, shape index: {}]   ;;  %s1608_s3 = inlined_call_operand.vmem [shape: f32[2,8,32], index: 3, kind: output, shape index: {0}]   ;;  %s1609_s4 = inlined_call_operand.hbm [shape: f32[2,4,8,8], index: 4, kind: output, shape index: {1}]  }
   0x1   :  { %12 = vsyncpa [#allocation4 + $0x1], 0  ;;  %s1398_s15 = smov 0   ;;  %s1400_s16 = smov 0  }
   0x2   :  { %s1402_s17 = smov 0   ;;  %s1404_s18 = smov 0  }
   0x3   :  { %s1406_s19 = smov 0   ;;  %s1408_s20 = smov 0  }
   0x4 LB: > { %s1116_s21 = sadd.s32 4294967295, %s1361_s20   ;;  %s1117_s22 = sadd.s32 4294967294, %s1361_s20   ;;  %s1361_s20 = sphi %s1408_s20, %s18_s20   ;;  %s1357_s19 = sphi %s1406_s19, %s1616_s19   ;;  %s1353_s18 = sphi %s1404_s18, %s1615_s18   ;;  %s1349_s17 = sphi %s1402_s17, %s1614_s17   ;;  %s1345_s16 = sphi %s1400_s16, %s1613_s16   ;;  %s1341_s15 = sphi %s1398_s15, %s1612_s15  }
   0x5   : > { %s30_s23 = sadd.s32 1, %s1357_s19  ;;  %s147_s24 = sadd.s32 1, %s1349_s17 }
   0x6   : > { %p32_p0 = scmp.ge.s32.totalorder %s30_s23, 2  ;;  %p157_p1 = scmp.ne.s32.totalorder %s1349_s17, %s1345_s16 }
   0x7   : > { %p158_p2 = scmp.eq.s32.totalorder %s1116_s21, 1  ;;  %p163_p3 = scmp.ne.s32.totalorder %s1345_s16, %s1341_s15 }
   0x8   : > { %s1618_s23 = smov (%p32_p0, %s30_s23), 0  ;;  %p164_p5 = scmp.eq.s32.totalorder %s1117_s22, 1 }
   0x9   : > { %p1438_p4 = por %p158_p2, %p157_p1  ;;  %s142_s26 = ssub.s32 %s1357_s19, %s1618_s23 }
   0xa   : > { %p1120_p6 = scmp.ge.s32.totalorder %s1361_s20, 1  ;;  %p145_p7 = scmp.eq.s32.totalorder %s142_s26, 0 }
   0xb   : > { %p1445_p8 = por %p164_p5, %p163_p3  ;;  %p206_p9 = scmp.lt.s32.totalorder %s1361_s20, 3 }
   0xc   : > { %s1451_s28 = scalar_select %p145_p7, %s1349_s17, %s147_s24  }
   0xd   : > { %p207_p10 = pnand %p1120_p6, %p206_p9 }
   0xe   : > { %p249_p11 = scmp.lt.s32.totalorder (!%p207_p10), %s1353_s18, 1  ;;  %v1363_v0 = vmov (!%p207_p10), 0.0   ;;  %vm1364_vm0 = vmmov (!%p207_p10), 0   ;;  %vm275_vm1 = vcmask (!%p207_p10), 64512   ;;  %s1365_s11 = smov (!%p207_p10), 120  }
   0xf   : > { %210 = sbr.rel (%p207_p10) target bundleno = 1475 (0x5c3), region = 32  ;;  %1163 = vmatprep.subr.mxu0 (!%p207_p10), %v1363_v0  ;;  %1165 = vmatprep.mubr.msk.f32.mxu0 (!%p207_p10), %vm1364_vm0, %v1363_v0  ;;  %s1366_s12 = smov (!%p207_p10), 112  }
  0x10   : > { %1168 = vmatprep.subr.mxu1 (!%p207_p10), %v1363_v0  ;;  %1170 = vmatprep.mubr.msk.f32.mxu1 (!%p207_p10), %vm1364_vm0, %v1363_v0  ;;  %s1367_s13 = smov (!%p207_p10), 104   ;;  %s246_s24 = sand.u32 (!%p207_p10), 1, %s1345_s16  }
  0x11   : > { %s1121_s26 = sshll.u32 (!%p207_p10), %s246_s24, 5  ;;  %s1368_s5 = smov (!%p207_p10), 8  }
  0x12   : > { %s1369_s6 = smov (!%p207_p10), 16  }
  0x16   : > { %s250_s29 = scalar_select %p249_p11, %s1353_s18, 1 }
  0x18   : > { %s1461_s30 = sshll.u32 %s250_s29, 3  ;;  %s1495_s29 = scalar_lea.vmem [#allocation3], %s1121_s26 }
  0x19   : > { %s259_s7 = scalar_lea.vmem %s1606_s1, %s1461_s30  ;;  %s255_s10 = scalar_lea.vmem %s1605_s0, %s1461_s30 }
  0x1a   : > { %v273_v1 = vld [vmem:[%s259_s7] sm:$0xff]  ;;  %s263_s22 = scalar_lea.vmem %s1607_s2, %s1461_s30  ;;  %s1146_s7 = sshll.u32 %s1353_s18, 9 }
  0x1b   : > { %1164 = vmatpush3.xpose.msk.msra.mxu0 %vm275_vm1, %v273_v1  ;;  %v271_v2 = vld [vmem:[%s255_s10] sm:$0xff]  ;;  %440 = vrot.lane.b32.xlu1 %v273_v1, %s1365_s11  ;;  %s986_s8 = sshll.u32 %s1495_s29, 4  ;;  %s1370_s18 = smov [#allocation3]   ;;  %s1550_s8 = int_to_ptr.vmem [resolvable:$true] %s986_s8 }
  0x1c   : > { %v272_v3 = vmul.f32 0.35355338, %v271_v2  ;;  %1178 = vmatprep.subr.mxu0 %v1363_v0  ;;  %v1487_v12 = vld [vmem:[%s263_s22] sm:$0xff]  ;;  %s1287_s14 = sshll.u32 %s1370_s18, 4  ;;  %s1288_s14 = int_to_ptr.vmem [resolvable:$false] %s1287_s14 }
  0x1d   : > { %1169 = vmatpush3.msra.mxu1 %v1487_v12  ;;  %s1289_s21 = scalar_lea.vmem %s1288_s14, 1024  ;;  %p1290_p1 = scmp.lt.s32.totalorder %s1550_s8, %s1288_s14 }
  0x1e   : > { %1166 = vmatmul.mubr.msk.f32.vlgmr.msra.gmra.mrb[0].mxu0 %vm275_vm1, %v272_v3  ;;  %1173 = vmatprep.subr.mxu1 %v1363_v0 }
  0x1f   : > { %1180 = vmatprep.mubr.msk.f32.mxu0 %vm1364_vm0, %v1363_v0  ;;  %438 = vrot.lane.b32.xlu1 %v272_v3, %s1365_s11 }
  0x23   : > { %612 = vrot.lane.b32.xlu1 %v272_v3, %s1366_s12 }
  0x27   : > { %787 = vrot.lane.b32.xlu1 %v273_v1, %s1367_s13 }
  0x2b   : > { %785 = vrot.lane.b32.xlu1 %v272_v3, %s1367_s13 }
  0x8d   : > { %v441_v13 = vpop.permute.xlu1 %440 }
  0x91   : > { %v439_v15 = vpop.permute.xlu1 %438 }
  0x95   : > { %v613_v17 = vpop.permute.xlu1 %612 }
  0x99   : > { %v788_v20 = vpop.permute.xlu1 %787 }
  0x9d   : > { %v786_v21 = vpop.permute.xlu1 %785 }
  0xf1   : > { %v348_v4 = vpop.f32.mrb[0].mxu0 }
  0xf2   : > { %v1167_v5 = vpop.f32.mrb[1].mxu0  ;;  %v352_v6 = vsel %vm275_vm1, %v348_v4, -inf }
  0xf3   : > { %353 = vmax.xlane.f32.xlu0 %v352_v6 }
 0x180   : > { %v354_v7 = vpop.xlane.xlu0 %353 }
 0x181   : > { %v355_v8 = vsub.f32 %v348_v4, %v354_v7 }
 0x183   : > { %v356_v9 = vmul.f32 1.442695, %v355_v8 }
 0x185   : > { %1267 = vpow2.f32 %v356_v9 }
 0x18f   : > { %v1268_v10 = vpop.eup %1267 }
 0x190   : > { %v358_v11 = vsel %vm275_vm1, %v1268_v10, 0.0 }
 0x191   : > { %359 = vadd.xlane.f32.xlu0 %v358_v11 }
 0x1a7   : > { %614 = vrot.lane.b32.xlu0 %v273_v1, %s1366_s12 }
 0x21e   : > { %v360_v14 = vpop.xlane.xlu0 %359 }
 0x21f   : > { %1269 = vrcp.f32 %v360_v14 }
 0x222   : > { %v615_v19 = vpop.permute.xlu0 %614 }
 0x229   : > { %v1270_v16 = vpop.eup %1269 }
 0x22a   : > { %v362_v18 = vmul.f32 %v1270_v16, %v1268_v10 }
 0x22c   : > { %363 = vst.msk [vmem:[%s1495_s29] sm:$0xff] %vm275_vm1, %v362_v18  ;;  %1171 = vmatmul.mubr.msk.f32.vlgmr.msra.gmra.mrb[0].mxu1 %vm275_vm1, %v362_v18 }
 0x22d   : > { %1174 = vmatpush3.xpose.msk.msra.mxu1 %vm275_vm1, %v441_v13  ;;  %1175 = vmatprep.mubr.msk.f32.mxu1 %vm1364_vm0, %v1363_v0 }
 0x22e   : > { %1183 = vmatprep.subr.mxu1 %v1363_v0 }
 0x230   : > { %1176 = vmatmul.mubr.msk.f32.vlgmr.msra.gmra.mrb[2].mxu1 %vm275_vm1, %v439_v15 }
 0x231   : > { %1184 = vmatpush3.xpose.msk.msra.mxu1 %vm275_vm1, %v615_v19  ;;  %1185 = vmatprep.mubr.msk.f32.mxu1 %vm1364_vm0, %v1363_v0 }
 0x232   : > { %1193 = vmatprep.subr.mxu1 %v1363_v0 }
 0x234   : > { %1186 = vmatmul.mubr.msk.f32.vlgmr.msra.gmra.mrb[4].mxu1 %vm275_vm1, %v613_v17 }
 0x235   : > { %1194 = vmatpush3.xpose.msk.msra.mxu1 %vm275_vm1, %v788_v20  ;;  %1195 = vmatprep.mubr.msk.f32.mxu1 %vm1364_vm0, %v1363_v0 }
 0x238   : > { %1196 = vmatmul.mubr.msk.f32.vlgmr.msra.gmra.mrb[6].mxu1 %vm275_vm1, %v786_v21 }
 0x2ff   : > { %v433_v22 = vpop.f32.mrb[0].mxu1 }
 0x300   : > { %437 = vst.msk [vmem:[#allocation2] sm:$0xff] %vm275_vm1, %v433_v22  ;;  %v1172_v23 = vpop.f32.mrb[1].mxu1 }
 0x303   : > { %v512_v24 = vpop.f32.mrb[2].mxu1 }
 0x304   : > { %v1177_v25 = vpop.f32.mrb[3].mxu1  ;;  %v516_v26 = vsel %vm275_vm1, %v512_v24, -inf }
 0x305   : > { %517 = vmax.xlane.f32.xlu1 %v516_v26 }
 0x307   : > { %v686_v27 = vpop.f32.mrb[4].mxu1 }
 0x308   : > { %v690_v28 = vsel %vm275_vm1, %v686_v27, -inf  ;;  %v1187_v29 = vpop.f32.mrb[5].mxu1 }
 0x309   : > { %691 = vmax.xlane.f32.xlu0 %v690_v28 }
 0x30b   : > { %v859_v30 = vpop.f32.mrb[6].mxu1 }
 0x30c   : > { %v863_v31 = vsel %vm275_vm1, %v859_v30, -inf  ;;  %v1197_v32 = vpop.f32.mrb[7].mxu1 }
 0x30d   : > { %864 = vmax.xlane.f32.xlu1 %v863_v31 }
 0x392   : > { %v518_v33 = vpop.xlane.xlu1 %517 }
 0x393   : > { %v519_v34 = vsub.f32 %v512_v24, %v518_v33 }
 0x395   : > { %v520_v35 = vmul.f32 1.442695, %v519_v34 }
 0x396   : > { %v692_v36 = vpop.xlane.xlu0 %691 }
 0x397   : > { %1271 = vpow2.f32 %v520_v35  ;;  %v693_v37 = vsub.f32 %v686_v27, %v692_v36 }
 0x399   : > { %v694_v38 = vmul.f32 1.442695, %v693_v37 }
 0x39a   : > { %v865_v43 = vpop.xlane.xlu1 %864 }
 0x39b   : > { %1273 = vpow2.f32 %v694_v38  ;;  %v866_v44 = vsub.f32 %v859_v30, %v865_v43 }
 0x39d   : > { %v867_v45 = vmul.f32 1.442695, %v866_v44 }
 0x39f   : > { %1275 = vpow2.f32 %v867_v45 }
 0x3a1   : > { %v1272_v39 = vpop.eup %1271 }
 0x3a2   : > { %v522_v40 = vsel %vm275_vm1, %v1272_v39, 0.0 }
 0x3a3   : > { %523 = vadd.xlane.f32.xlu1 %v522_v40 }
 0x3a5   : > { %v1274_v41 = vpop.eup %1273 }
 0x3a6   : > { %v696_v42 = vsel %vm275_vm1, %v1274_v41, 0.0 }
 0x3a7   : > { %697 = vadd.xlane.f32.xlu0 %v696_v42 }
 0x3a9   : > { %v1276_v46 = vpop.eup %1275 }
 0x3aa   : > { %v869_v47 = vsel %vm275_vm1, %v1276_v46, 0.0 }
 0x3b4   : > { %703 = vrot.lane.b32.xlu1 %v1487_v12, %s1366_s12  ;;  %s1554_s12 = scalar_lea.sflag [#allocation4], %s246_s24 }
 0x3bd   : > { %530 = vrot.lane.b32.xlu0 %v1487_v12, %s1365_s11  ;;  %s1548_s11 = scalar_lea.hbm %s1609_s4, %s1146_s7 }
 0x3d8   : > { %870 = vadd.xlane.f32.xlu1 %v869_v47 }
 0x3e9   : > { %876 = vrot.lane.b32.xlu1 %v1487_v12, %s1367_s13  ;;  %s1283_s13 = scalar_lea.vmem %s1550_s8, 512 }
 0x3ea   : > { %p1284_p12 = scmp.ne.s32.totalorder %s1550_s8, %s1283_s13  ;;  %p1291_p2 = scmp.lt.s32.totalorder %s1289_s21, %s1283_s13 }
 0x3ec   : > { %p1285_p13 = pnand %p1284_p12, %p1438_p4  ;;  %p1292_p3 = por %p1291_p2, %p1290_p1 }
 0x3ee   : > { %p1286_p0 = pneg %p1285_p13 }
 0x3f0   : > { %p1293_p5 = pnand %p1292_p3, %p1286_p0 }
 0x430   : > { %v524_v48 = vpop.xlane.xlu1 %523 }
 0x431   : > { %1277 = vrcp.f32 %v524_v48 }
 0x434   : > { %v698_v49 = vpop.xlane.xlu0 %697  ;;  %v704_v53 = vpop.permute.xlu1 %703 }
 0x435   : > { %1279 = vrcp.f32 %v698_v49 }
 0x438   : > { %v531_v50 = vpop.permute.xlu0 %530 }
 0x439   : > { %1179 = vmatpush3.msra.mxu0 %v531_v50 }
 0x43a   : > { %1188 = vmatprep.subr.mxu0 %v1363_v0 }
 0x43b   : > { %v1278_v51 = vpop.eup %1277 }
 0x43c   : > { %v526_v52 = vmul.f32 %v1278_v51, %v1272_v39 }
 0x43e   : > { %1131 = vst.msk [vmem:[%s1495_s29 + $0x8] sm:$0xff] %vm275_vm1, %v526_v52  ;;  %1181 = vmatmul.mubr.msk.f32.vlgmr.msra.gmra.mrb[2].mxu0 %vm275_vm1, %v526_v52 }
 0x43f   : > { %v1280_v54 = vpop.eup %1279  ;;  %1189 = vmatpush3.msra.mxu0 %v704_v53  ;;  %1190 = vmatprep.mubr.msk.f32.mxu0 %vm1364_vm0, %v1363_v0 }
 0x440   : > { %v700_v55 = vmul.f32 %v1280_v54, %v1274_v41  ;;  %1198 = vmatprep.subr.mxu0 %v1363_v0 }
 0x442   : > { %1135 = vst.msk [vmem:[%s1495_s29 + $0x10] sm:$0xff] %vm275_vm1, %v700_v55  ;;  %1191 = vmatmul.mubr.msk.f32.vlgmr.msra.gmra.mrb[4].mxu0 %vm275_vm1, %v700_v55 }
 0x443   : > { %1200 = vmatprep.mubr.msk.f32.mxu0 %vm1364_vm0, %v1363_v0 }
 0x465   : > { %v871_v56 = vpop.xlane.xlu1 %870 }
 0x466   : > { %1281 = vrcp.f32 %v871_v56 }
 0x469   : > { %v877_v57 = vpop.permute.xlu1 %876 }
 0x46a   : > { %1199 = vmatpush3.msra.mxu0 %v877_v57 }
 0x470   : > { %v1282_v58 = vpop.eup %1281 }
 0x471   : > { %v873_v59 = vmul.f32 %v1282_v58, %v1276_v46 }
 0x473   : > { %1139 = vst.msk [vmem:[%s1495_s29 + $0x18] sm:$0xff] %vm275_vm1, %v873_v59  ;;  %1201 = vmatmul.mubr.msk.f32.vlgmr.msra.gmra.mrb[6].mxu0 %vm275_vm1, %v873_v59 }
 0x511   : > { %v602_v60 = vpop.f32.mrb[2].mxu0 }
 0x512   : > { %607 = vrot.lane.b32.xlu0 %v602_v60, %s1368_s5  ;;  %v1182_v61 = vpop.f32.mrb[3].mxu0 }
 0x515   : > { %v775_v62 = vpop.f32.mrb[4].mxu0 }
 0x516   : > { %780 = vrot.lane.b32.xlu1 %v775_v62, %s1369_s6  ;;  %v1192_v63 = vpop.f32.mrb[5].mxu0 }
 0x517   : > { %1296 = shalt.err (!%p1293_p5)
}
 0x518   : > { %s1297_s22 = scalar_lea.hbm %s1548_s11, 512  ;;  %s1301_s29 = scalar_lea.hbm %s1609_s4, 1024 }
 0x519   : > { %p1298_p6 = scmp.ne.s32.totalorder %s1548_s11, %s1297_s22  ;;  %p1302_p10 = scmp.lt.u32.totalorder %s1548_s11, %s1609_s4 }
 0x51a   : > { %p1303_p11 = scmp.lt.u32.totalorder %s1301_s29, %s1297_s22  ;;  %p1305_p13 = scmp.lt.u32.totalorder %s1297_s22, %s1548_s11 }
 0x51b   : > { %p1299_p7 = pnand %p1298_p6, %p1438_p4 }
 0x51c   : > { %p1304_p12 = por %p1303_p11, %p1302_p10 }
 0x51d   : > { %p1300_p9 = pneg %p1299_p7 }
 0x51e   : > { %p1306_p0 = por %p1305_p13, %p1304_p12 }
 0x520   : > { %p1307_p1 = pnand %p1306_p0, %p1300_p9 }
 0x522   : > { %1310 = shalt.err (!%p1307_p1)
}
 0x523   : > { %s1371_s9 = smov 128   ;;  %s1372_s10 = smov 24   ;;  %vm610_vm2 = vcmask 130112   ;;  %vm783_vm3 = vcmask 195712   ;;  %vm956_vm4 = vcmask 261312   ;;  %vm959_vm5 = vcmask 261120  }
 0x524   : > { %1203 = dma.vmem_to_hbm [thread:$0]  (%p1438_p4), %s1550_s8, 512, %s1548_s11, %s1554_s12, %s1371_s9, %s1371_s9, %s1368_s5  }
 0x525   : > { %s270_s18 = scalar_lea.vmem %s1608_s3, %s1461_s30 }
 0x546   : > { %v948_v0 = vpop.f32.mrb[6].mxu0 }
 0x547   : > { %953 = vrot.lane.b32.xlu0 %v948_v0, %s1372_s10  ;;  %v1202_v1 = vpop.f32.mrb[7].mxu0 }
 0x584   : > { %v608_v2 = vpop.permute.xlu0 %607 }
 0x585   : > { %611 = vst.msk [vmem:[#allocation2] sm:$0xff] %vm610_vm2, %v608_v2 }
 0x588   : > { %v781_v3 = vpop.permute.xlu1 %780 }
 0x589   : > { %784 = vst.msk [vmem:[#allocation2] sm:$0xff] %vm783_vm3, %v781_v3 }
 0x5b9   : > { %v954_v4 = vpop.permute.xlu0 %953 }
 0x5ba   : > { %957 = vst.msk [vmem:[#allocation2] sm:$0xff] %vm956_vm4, %v954_v4 }
 0x5c1   : > { %v958_v5 = vld [vmem:[#allocation2] sm:$0xff] }
 0x5c2   : > { %960 = vst.msk [vmem:[%s270_s18] sm:$0xff] %vm959_vm5, %v958_v5 }
 0x5c3 PF: > { %p1209_p4 = scmp.ge.s32.totalorder %s1361_s20, 2  ;;  %s1011_s5 = sand.u32 1, %s1341_s15  }
 0x5c4   : > { %s1012_s8 = scalar_lea.sflag [#allocation4], %s1011_s5 }
 0x5c5   : > { %p1206_p2 = pnand %p1209_p4, %p1445_p8 }
 0x5c7   : > { %1336 = dma.done.wait (!%p1206_p2), %s1012_s8, 512  }
 0x5c8   : > { %1338 = vsyncadd (!%p1206_p2), %s1012_s8, 4294966784  ;;  %s18_s20 = sadd.s32 1, %s1361_s20   ;;  %s1612_s15 = smov %s1345_s16 }
 0x5c9   : > { %p15_p3 = scmp.ge.s32.totalorder %s18_s20, 4   ;;  %s1613_s16 = smov %s1349_s17 }
 0x5ca   : > { %s1614_s17 = smov %s1451_s28  ;;  %s1615_s18 = smov %s1357_s19 }
 0x5cb   : > { %s1616_s19 = smov %s1618_s23  ;;  %17 = sbr.rel (!%p15_p3) target bundleno = 4 (0x4), region = 88 }
 0x5d2   :  { %1017 = vsyncpa [#allocation4], 1 }
 0x5d3   :  { %1019 = vsyncpa [#allocation4 + $0x1], 1 }

</bundles_post_ra>
